<compile_context>
chip_gen: v7x
topology: tpu7x:2x2x1
jax: 0.10.0
libtpu: 0.0.40
codegen_flags: <defaults>
</compile_context>

<pallas_src>
import functools

import jax
import jax.numpy as jnp
import numpy as np
from jax.experimental import pallas as pl
from jax.experimental.pallas import tpu as pltpu


def _round_up(a, b):
    return ((a + b - 1) // b) * b


# ------------- kernel 1: xw = (x @ W_pad) * norm_src  (linear-first) --------
def linear_kernel(x_ref, w_ref, ns_ref, xw_ref):
    xw = jnp.dot(x_ref[...], w_ref[...], preferred_element_type=jnp.float32)
    xw_ref[...] = (xw * ns_ref[...]).astype(xw_ref.dtype)


# ------------- kernel 2: out = sigmoid(norm_dst * (A @ xw) + b) -------------
def aggregate_kernel(adj_ref, xw_ref, nd_ref, b_ref, out_ref, acc_ref):
    k = pl.program_id(1)

    @pl.when(k == 0)
    def _():
        acc_ref[...] = jnp.zeros_like(acc_ref)

    # bf16 adjacency block x bf16 feature block on the MXU, f32 accumulation.
    acc_ref[...] += jnp.dot(adj_ref[...], xw_ref[...],
                            preferred_element_type=jnp.float32)

    @pl.when(k == pl.num_programs(1) - 1)
    def _():
        h = acc_ref[...] * nd_ref[...] + b_ref[...]
        out_ref[...] = (1.0 / (1.0 + jnp.exp(-h))).astype(out_ref.dtype)


@functools.partial(jax.jit, static_argnames=("tm", "tk"))
def gcn_forward(adj, x, w, b, *, tm=512, tk=1024):
    """adj: (N, N) dense adjacency A[dst, src]; x: (N, F_in);
    w: (F_in, F_out) = GraphConv weight; b: (1, F_out)."""
    N, F_in = x.shape
    F_out = w.shape[1]
    Fp = _round_up(F_out, 128)          # lane-dense output width

    # Per-graph degree normalizations (constants) — computed once in the
    # wrapper instead of burning XLU/VALU slots per adjacency tile.
    norm_src = jax.lax.rsqrt(jnp.maximum(jnp.sum(adj, axis=0), 1.0))  # (N,)
    norm_dst = jax.lax.rsqrt(jnp.maximum(jnp.sum(adj, axis=1), 1.0))  # (N,)

    # Tile sizes: clamp to (padded) problem size; tm rows, tk reduction cols.
    tm = min(tm, _round_up(N, 8))
    tk = min(tk, _round_up(N, 128))
    Np_r = _round_up(N, tm)             # padded dst rows
    Np_c = _round_up(N, tk)             # padded src cols

    f32 = jnp.float32
    adj_p = jnp.zeros((Np_r, Np_c), jnp.bfloat16).at[:N, :N].set(
        adj.astype(jnp.bfloat16))                        # 0/1 -> lossless bf16
    x_p = jnp.zeros((Np_c, F_in), f32).at[:N, :].set(x.astype(f32))
    ns_p = jnp.zeros((Np_c, 1), f32).at[:N, 0].set(norm_src)
    nd_p = jnp.zeros((Np_r, 1), f32).at[:N, 0].set(norm_dst)
    w_p = jnp.zeros((F_in, Fp), f32).at[:, :F_out].set(w.astype(f32))
    b_p = jnp.zeros((1, Fp), f32).at[:, :F_out].set(b.reshape(1, F_out).astype(f32))

    # ---- stage 1: xw = (x @ W) * norm_src, computed once, stored bf16 ------
    xw = pl.pallas_call(
        linear_kernel,
        out_shape=jax.ShapeDtypeStruct((Np_c, Fp), jnp.bfloat16),
        grid=(Np_c // tk,),
        in_specs=[
            pl.BlockSpec((tk, F_in), lambda i: (i, 0)),
            pl.BlockSpec((F_in, Fp), lambda i: (0, 0)),
            pl.BlockSpec((tk, 1), lambda i: (i, 0)),
        ],
        out_specs=pl.BlockSpec((tk, Fp), lambda i: (i, 0)),
        compiler_params=pltpu.CompilerParams(
            dimension_semantics=("parallel",)),
    )(x_p, w_p, ns_p)

    # ---- stage 2: tiled aggregation + normalization + bias + sigmoid -------
    vmem_bytes = int(
        2 * (tm * tk * 2 + tk * Fp * 2 + tm * 4 + Fp * 4 + tm * Fp * 4)
        + tm * Fp * 4 + (8 << 20))
    vmem_bytes = min(max(vmem_bytes, 32 << 20), 64 << 20)   # safe on v5e/v6e/v7x

    cost = pl.CostEstimate(
        flops=2 * Np_r * Np_c * Fp + 2 * Np_c * F_in * Fp,
        transcendentals=Np_r * Fp,
        bytes_accessed=adj_p.size * 2 + (Np_r // tm) * Np_c * Fp * 2
        + Np_r * Fp * 4)

    out_p = pl.pallas_call(
        aggregate_kernel,
        out_shape=jax.ShapeDtypeStruct((Np_r, Fp), jnp.float32),
        grid=(Np_r // tm, Np_c // tk),
        in_specs=[
            pl.BlockSpec((tm, tk), lambda i, k: (i, k)),   # adjacency tile
            pl.BlockSpec((tk, Fp), lambda i, k: (k, 0)),   # xw tile
            pl.BlockSpec((tm, 1), lambda i, k: (i, 0)),    # norm_dst
            pl.BlockSpec((1, Fp), lambda i, k: (0, 0)),    # bias
        ],
        out_specs=pl.BlockSpec((tm, Fp), lambda i, k: (i, 0)),
        scratch_shapes=[pltpu.VMEM((tm, Fp), jnp.float32)],
        compiler_params=pltpu.CompilerParams(
            dimension_semantics=("parallel", "arbitrary"),
            vmem_limit_bytes=vmem_bytes),
        cost_estimate=cost,
    )(adj_p, xw, nd_p, b_p)

    return out_p[:N, :F_out]


def reference(adj, x, w, b):
    adj = np.asarray(adj, np.float64)
    x = np.asarray(x, np.float64)
    w = np.asarray(w, np.float64)
    b = np.asarray(b, np.float64)
    norm_src = np.maximum(adj.sum(axis=0), 1.0) ** -0.5
    norm_dst = np.maximum(adj.sum(axis=1), 1.0) ** -0.5
    h = adj @ ((x * norm_src[:, None]) @ w)
    h = h * norm_dst[:, None] + b
    return 1.0 / (1.0 + np.exp(-h))


if __name__ == "__main__":
    # Small synthetic graph: N=16 nodes, in_feats=32, num_classes=8.
    # TODO(synk): the single 16-node graph is pure launch overhead on TPU —
    # batch many graphs (block-diagonal adjacency) for a realistic workload.
    N, in_feats, num_classes = 16, 32, 8

    key = jax.random.PRNGKey(0)
    k_adj, k_x, k_w, k_b = jax.random.split(key, 4)

    # Random Erdos-Renyi style adjacency A[dst, src], float32 0/1.
    adj = (jax.random.uniform(k_adj, (N, N)) < 0.3).astype(jnp.float32)

    # Node features and synthetic GraphConv parameters.
    x = jax.random.normal(k_x, (N, in_feats), dtype=jnp.float32)
    w = jax.random.normal(k_w, (in_feats, num_classes), dtype=jnp.float32) * 0.1
    b = jax.random.normal(k_b, (1, num_classes), dtype=jnp.float32) * 0.01

    out = gcn_forward(adj, x, w, b)
    out = jax.block_until_ready(out)

    ref = reference(adj, x, w, b)
    assert out.shape == (N, num_classes)
    assert np.allclose(np.asarray(out, np.float64), ref, rtol=2e-2, atol=2e-3), (
        np.abs(np.asarray(out, np.float64) - ref).max())

    print("KERNEL_OK")
</pallas_src>

<mosaic_0001>
module attributes {stable_mosaic.version = 11 : i64} {
  func.func @linear_kernel(%arg0: i32, %arg1: memref<128x32xf32, #tpu.memory_space<vmem>>, %arg2: memref<32x128xf32, #tpu.memory_space<vmem>>, %arg3: memref<128x1xf32, #tpu.memory_space<vmem>>, %arg4: memref<128x128xbf16, #tpu.memory_space<vmem>>) attributes {dimension_semantics = [#tpu.dimension_semantics<parallel>], iteration_bounds = array<i64: 1>, scalar_prefetch = 0 : i64, scratch_operands = 0 : i64, tpu.core_type = #tpu.core_type<tc>, window_params = [{transform_indices = @transform_0, window_bounds = array<i64: 128, 32>}, {pipeline_mode = #tpu.pipeline_mode<synchronous>, transform_indices = @transform_1, window_bounds = array<i64: 32, 128>}, {transform_indices = @transform_2, window_bounds = array<i64: 128, 1>}, {transform_indices = @transform_3, window_bounds = array<i64: 128, 128>}]} {
    %c0 = arith.constant 0 : index
    %c0_0 = arith.constant 0 : index
    %0 = vector.load %arg1[%c0, %c0_0] : memref<128x32xf32, #tpu.memory_space<vmem>>, vector<128x32xf32>
    %c0_1 = arith.constant 0 : index
    %c0_2 = arith.constant 0 : index
    %1 = vector.load %arg2[%c0_1, %c0_2] : memref<32x128xf32, #tpu.memory_space<vmem>>, vector<32x128xf32>
    %cst = arith.constant dense<0.000000e+00> : vector<128x128xf32>
    %2 = tpu.matmul %0, %1, %cst {dimension_numbers = #tpu.dot_dimension_numbers<[1], [0], [0], [1], [0, 0, 1, 1], [], []>} : vector<128x32xf32>, vector<32x128xf32>, vector<128x128xf32> -> vector<128x128xf32>
    %c0_3 = arith.constant 0 : index
    %c0_4 = arith.constant 0 : index
    %3 = vector.load %arg3[%c0_3, %c0_4] : memref<128x1xf32, #tpu.memory_space<vmem>>, vector<128x1xf32>
    %4 = vector.broadcast %3 : vector<128x1xf32> to vector<128x128xf32>
    %5 = arith.mulf %2, %4 : vector<128x128xf32>
    %6 = arith.truncf %5 : vector<128x128xf32> to vector<128x128xbf16>
    %c0_5 = arith.constant 0 : index
    %c0_6 = arith.constant 0 : index
    %7 = vector.load %arg4[%c0_5, %c0_6] : memref<128x128xbf16, #tpu.memory_space<vmem>>, vector<128x128xbf16>
    tpu.vector_store %arg4[%c0_5, %c0_6], %6 {strides = array<i32>} : memref<128x128xbf16, #tpu.memory_space<vmem>>, vector<128x128xbf16>,
    return
  }
  func.func @transform_0(%arg0: i32) -> (i32, i32) {
    %c0_i32 = arith.constant 0 : i32
    %c0_i32_0 = arith.constant 0 : i32
    return %arg0, %c0_i32 : i32, i32
  }
  func.func @transform_1(%arg0: i32) -> (i32, i32) {
    %c0_i32 = arith.constant 0 : i32
    %c0_i32_0 = arith.constant 0 : i32
    %c0_i32_1 = arith.constant 0 : i32
    return %c0_i32, %c0_i32_0 : i32, i32
  }
  func.func @transform_2(%arg0: i32) -> (i32, i32) {
    %c0_i32 = arith.constant 0 : i32
    %c0_i32_0 = arith.constant 0 : i32
    return %arg0, %c0_i32 : i32, i32
  }
  func.func @transform_3(%arg0: i32) -> (i32, i32) {
    %c0_i32 = arith.constant 0 : i32
    %c0_i32_0 = arith.constant 0 : i32
    return %arg0, %c0_i32 : i32, i32
  }
}

module attributes {stable_mosaic.version = 11 : i64} {
  func.func @aggregate_kernel(%arg0: i32, %arg1: i32, %arg2: memref<16x128xbf16, #tpu.memory_space<vmem>>, %arg3: memref<128x128xbf16, #tpu.memory_space<vmem>>, %arg4: memref<16x1xf32, #tpu.memory_space<vmem>>, %arg5: memref<1x128xf32, #tpu.memory_space<vmem>>, %arg6: memref<16x128xf32, #tpu.memory_space<vmem>>, %arg7: memref<16x128xf32, #tpu.memory_space<vmem>>) attributes {dimension_semantics = [#tpu.dimension_semantics<parallel>, #tpu.dimension_semantics<arbitrary>], iteration_bounds = array<i64: 1, 1>, scalar_prefetch = 0 : i64, scratch_operands = 1 : i64, tpu.core_type = #tpu.core_type<tc>, window_params = [{transform_indices = @transform_0, window_bounds = array<i64: 16, 128>}, {transform_indices = @transform_1, window_bounds = array<i64: 128, 128>}, {transform_indices = @transform_2, window_bounds = array<i64: 16, 1>}, {pipeline_mode = #tpu.pipeline_mode<synchronous>, transform_indices = @transform_3, window_bounds = array<i64: 1, 128>}, {transform_indices = @transform_4, window_bounds = array<i64: 16, 128>}]} {
    %c0_i32 = arith.constant 0 : i32
    %0 = arith.cmpi eq, %arg1, %c0_i32 : i32
    %1 = arith.extui %0 : i1 to i32
    %c0_i32_0 = arith.constant 0 : i32
    %2 = arith.cmpi ne, %1, %c0_i32_0 : i32
    scf.if %2 {
      %cst_10 = arith.constant 0.000000e+00 : f32
      %12 = vector.broadcast %cst_10 : f32 to vector<16x128xf32>
      %c0_11 = arith.constant 0 : index
      %c0_12 = arith.constant 0 : index
      %13 = vector.load %arg7[%c0_11, %c0_12] : memref<16x128xf32, #tpu.memory_space<vmem>>, vector<16x128xf32>
      tpu.vector_store %arg7[%c0_11, %c0_12], %12 {strides = array<i32>} : memref<16x128xf32, #tpu.memory_space<vmem>>, vector<16x128xf32>,
    } else {
    }
    %c0 = arith.constant 0 : index
    %c0_1 = arith.constant 0 : index
    %3 = vector.load %arg7[%c0, %c0_1] : memref<16x128xf32, #tpu.memory_space<vmem>>, vector<16x128xf32>
    %c0_2 = arith.constant 0 : index
    %c0_3 = arith.constant 0 : index
    %4 = vector.load %arg2[%c0_2, %c0_3] : memref<16x128xbf16, #tpu.memory_space<vmem>>, vector<16x128xbf16>
    %c0_4 = arith.constant 0 : index
    %c0_5 = arith.constant 0 : index
    %5 = vector.load %arg3[%c0_4, %c0_5] : memref<128x128xbf16, #tpu.memory_space<vmem>>, vector<128x128xbf16>
    %cst = arith.constant dense<0.000000e+00> : vector<16x128xf32>
    %6 = tpu.matmul %4, %5, %cst {dimension_numbers = #tpu.dot_dimension_numbers<[1], [0], [0], [1], [0, 0, 1, 1], [], []>} : vector<16x128xbf16>, vector<128x128xbf16>, vector<16x128xf32> -> vector<16x128xf32>
    %7 = arith.addf %3, %6 : vector<16x128xf32>
    %c0_6 = arith.constant 0 : index
    %c0_7 = arith.constant 0 : index
    %8 = vector.load %arg7[%c0_6, %c0_7] : memref<16x128xf32, #tpu.memory_space<vmem>>, vector<16x128xf32>
    tpu.vector_store %arg7[%c0_6, %c0_7], %7 {strides = array<i32>} : memref<16x128xf32, #tpu.memory_space<vmem>>, vector<16x128xf32>,
    %c0_i32_8 = arith.constant 0 : i32
    %9 = arith.cmpi eq, %arg1, %c0_i32_8 : i32
    %10 = arith.extui %9 : i1 to i32
    %c0_i32_9 = arith.constant 0 : i32
    %11 = arith.cmpi ne, %10, %c0_i32_9 : i32
    scf.if %11 {
      %c0_10 = arith.constant 0 : index
      %c0_11 = arith.constant 0 : index
      %12 = vector.load %arg7[%c0_10, %c0_11] : memref<16x128xf32, #tpu.memory_space<vmem>>, vector<16x128xf32>
      %c0_12 = arith.constant 0 : index
      %c0_13 = arith.constant 0 : index
      %13 = vector.load %arg4[%c0_12, %c0_13] : memref<16x1xf32, #tpu.memory_space<vmem>>, vector<16x1xf32>
      %14 = vector.broadcast %13 : vector<16x1xf32> to vector<16x128xf32>
      %15 = arith.mulf %12, %14 : vector<16x128xf32>
      %c0_14 = arith.constant 0 : index
      %c0_15 = arith.constant 0 : index
      %16 = vector.load %arg5[%c0_14, %c0_15] : memref<1x128xf32, #tpu.memory_space<vmem>>, vector<1x128xf32>
      %17 = vector.broadcast %16 : vector<1x128xf32> to vector<16x128xf32>
      %18 = arith.addf %15, %17 : vector<16x128xf32>
      %cst_16 = arith.constant 0.000000e+00 : f32
      %19 = vector.broadcast %cst_16 : f32 to vector<16x128xf32>
      %20 = arith.subf %19, %18 : vector<16x128xf32>
      %21 = math.exp %20 : vector<16x128xf32>
      %cst_17 = arith.constant 1.000000e+00 : f32
      %22 = vector.broadcast %cst_17 : f32 to vector<16x128xf32>
      %23 = arith.addf %22, %21 : vector<16x128xf32>
      %cst_18 = arith.constant 1.000000e+00 : f32
      %24 = vector.broadcast %cst_18 : f32 to vector<16x128xf32>
      %25 = arith.divf %24, %23 : vector<16x128xf32>
      %c0_19 = arith.constant 0 : index
      %c0_20 = arith.constant 0 : index
      %26 = vector.load %arg6[%c0_19, %c0_20] : memref<16x128xf32, #tpu.memory_space<vmem>>, vector<16x128xf32>
      tpu.vector_store %arg6[%c0_19, %c0_20], %25 {strides = array<i32>} : memref<16x128xf32, #tpu.memory_space<vmem>>, vector<16x128xf32>,
    } else {
    }
    return
  }
  func.func @transform_0(%arg0: i32, %arg1: i32) -> (i32, i32) {
    %c0_i32 = arith.constant 0 : i32
    return %arg0, %arg1 : i32, i32
  }
  func.func @transform_1(%arg0: i32, %arg1: i32) -> (i32, i32) {
    %c0_i32 = arith.constant 0 : i32
    %c0_i32_0 = arith.constant 0 : i32
    return %arg1, %c0_i32 : i32, i32
  }
  func.func @transform_2(%arg0: i32, %arg1: i32) -> (i32, i32) {
    %c0_i32 = arith.constant 0 : i32
    %c0_i32_0 = arith.constant 0 : i32
    return %arg0, %c0_i32 : i32, i32
  }
  func.func @transform_3(%arg0: i32, %arg1: i32) -> (i32, i32) {
    %c0_i32 = arith.constant 0 : i32
    %c0_i32_0 = arith.constant 0 : i32
    %c0_i32_1 = arith.constant 0 : i32
    return %c0_i32, %c0_i32_0 : i32, i32
  }
  func.func @transform_4(%arg0: i32, %arg1: i32) -> (i32, i32) {
    %c0_i32 = arith.constant 0 : i32
    %c0_i32_0 = arith.constant 0 : i32
    return %arg0, %c0_i32 : i32, i32
  }
}

</mosaic_0001>

<bundles_post_ra>
// kernel: gcn_forward.3
= control target key start
LH: loop header
LB: loop body
LE: loop exit
PB: predicated region body
PF: predicated region fallthrough
CT: control target
= control target key end

     0   :  { %v249_v0 = vmov 0.0   ;;  %vm250_vm0 = vmmov 0   ;;  %v251_v2 = vmov 0   ;;  %s319_s1 = inlined_call_operand.vmem [shape: bf16[128,128], index: 1, kind: input, shape index: {}]   ;;  %s320_s2 = inlined_call_operand.vmem [shape: f32[16,1], index: 2, kind: input, shape index: {}]   ;;  %s321_s0 = inlined_call_operand.vmem [shape: bf16[16,128], index: 0, kind: input, shape index: {}]   ;;  %s322_s3 = inlined_call_operand.vmem [shape: f32[1,128], index: 3, kind: input, shape index: {}]   ;;  %s323_s4 = inlined_call_operand.vmem [shape: f32[16,128], index: 4, kind: output, shape index: {}]  }
   0x1   :  { %208 = vmatprep.subr.bf16.mxu0 %v249_v0  ;;  %v232_v1 = vld [vmem:[%s319_s1] sm:$0xff]   ;;  %224 = vmatprep.mubr.msk.bf16.mxu0 %vm250_vm0, %v249_v0  ;;  %v233_v3 = vld [vmem:[%s319_s1 + $0x8] sm:$0xff]   ;;  %v234_v4 = vld [vmem:[%s319_s1 + $0x10] sm:$0xff]  }
   0x2   :  { %231 = vset.pattern.permute.xlu0 %v251_v2  ;;  %209 = vmatpush3.bf16.msra.mxu0 %v232_v1  ;;  %v148_v5 = vld [vmem:[%s320_s2] sm:$0xff]  ;;  %v235_v6 = vld [vmem:[%s319_s1 + $0x18] sm:$0xff]   ;;  %v149_v7 = vld [vmem:[%s320_s2 + $0x8] sm:$0xff] }
   0x3   :  { %210 = vmatprep.subr.bf16.mxu0 %v249_v0  ;;  %152 = vperm.xlu0 %231, %v148_v5   ;;  %v236_v8 = vld [vmem:[%s319_s1 + $0x20] sm:$0xff]   ;;  %v237_v9 = vld [vmem:[%s319_s1 + $0x28] sm:$0xff]   ;;  %v238_v10 = vld [vmem:[%s319_s1 + $0x30] sm:$0xff]  }
   0x4   :  { %v239_v11 = vld [vmem:[%s319_s1 + $0x38] sm:$0xff]   ;;  %v240_v12 = vld [vmem:[%s321_s0] sm:$0xff]  }
   0x5   :  { %v198_v15 = vld [vmem:[%s322_s3] ss:$0 sm:$0xff] }
   0x6   :  { %211 = vmatpush3.bf16.msra.mxu0 %v233_v3 }
   0x7   :  { %212 = vmatprep.subr.bf16.mxu0 %v249_v0  ;;  %157 = vperm.xlu0 %231, %v149_v7  }
   0xa   :  { %213 = vmatpush3.bf16.msra.mxu0 %v234_v4 }
   0xb   :  { %214 = vmatprep.subr.bf16.mxu0 %v249_v0 }
   0xe   :  { %215 = vmatpush3.bf16.msra.mxu0 %v235_v6 }
   0xf   :  { %216 = vmatprep.subr.bf16.mxu0 %v249_v0 }
  0x12   :  { %217 = vmatpush3.bf16.msra.mxu0 %v236_v8 }
  0x13   :  { %218 = vmatprep.subr.bf16.mxu0 %v249_v0 }
  0x16   :  { %219 = vmatpush3.bf16.msra.mxu0 %v237_v9 }
  0x17   :  { %220 = vmatprep.subr.bf16.mxu0 %v249_v0 }
  0x1a   :  { %221 = vmatpush3.bf16.msra.mxu0 %v238_v10 }
  0x1b   :  { %222 = vmatprep.subr.bf16.mxu0 %v249_v0 }
  0x1e   :  { %223 = vmatpush3.bf16.msra.mxu0 %v239_v11 }
  0x21   :  { %225 = vmatmul.mubr.bf16.vlgmr.msra.gmra.mrb[0].mxu0 %v240_v12 }
  0x82   :  { %v153_v13 = vpop.permute.xlu0 %152 }
  0x86   :  { %v158_v18 = vpop.permute.xlu0 %157 }
  0xf4   :  { %v132_v14 = vpop.f32.mrb[0].mxu0 }
  0xf5   :  { %v160_v16 = vmul.f32 %v153_v13, %v132_v14  ;;  %v226_v17 = vpop.f32.mrb[1].mxu0 }
  0xf6   :  { %v135_v19 = vpop.f32.mrb[2].mxu0 }
  0xf7   :  { %v169_v20 = vadd.f32 %v198_v15, %v160_v16  ;;  %v161_v21 = vmul.f32 %v158_v18, %v135_v19  ;;  %v227_v22 = vpop.f32.mrb[3].mxu0 }
  0xf9   :  { %v171_v23 = vsub.f32 0.0, %v169_v20  ;;  %v170_v24 = vadd.f32 %v198_v15, %v161_v21 }
  0xfb   :  { %v173_v25 = vmul.f32 1.442695, %v171_v23  ;;  %v172_v26 = vsub.f32 0.0, %v170_v24 }
  0xfd   :  { %241 = vpow2.f32 %v173_v25  ;;  %v175_v27 = vmul.f32 1.442695, %v172_v26 }
  0xff   :  { %243 = vpow2.f32 %v175_v27 }
 0x107   :  { %v242_v28 = vpop.eup %241 }
 0x108   :  { %v177_v29 = vadd.f32 1.0, %v242_v28 }
 0x109   :  { %v244_v30 = vpop.eup %243 }
 0x10a   :  { %245 = vrcp.f32 %v177_v29  ;;  %v178_v31 = vadd.f32 1.0, %v244_v30 }
 0x10c   :  { %247 = vrcp.f32 %v178_v31 }
 0x114   :  { %v246_v32 = vpop.eup %245 }
 0x115   :  { %183 = vst [vmem:[%s323_s4] sm:$0xff] %v246_v32 }
 0x116   :  { %v248_v33 = vpop.eup %247 }
 0x117   :  { %184 = vst [vmem:[%s323_s4 + $0x8] sm:$0xff] %v248_v33 }

// kernel: gcn_forward.2
= control target key start
LH: loop header
LB: loop body
LE: loop exit
PB: predicated region body
PF: predicated region fallthrough
CT: control target
= control target key end

     0   :  { %vm34_vm0 = vcmask 261120   ;;  %v586_v3 = vmov 0   ;;  %s755_s1 = inlined_call_operand.vmem [shape: f32[32,128], index: 1, kind: input, shape index: {}]   ;;  %s756_s0 = inlined_call_operand.vmem [shape: f32[128,32], index: 0, kind: input, shape index: {}]   ;;  %s757_s2 = inlined_call_operand.vmem [shape: f32[128,1], index: 2, kind: input, shape index: {}]   ;;  %s758_s3 = inlined_call_operand.vmem [shape: bf16[128,128], index: 3, kind: output, shape index: {}]  }
   0x1   :  { %v30_v0 = vld [vmem:[%s755_s1] sm:$0xff]  ;;  %v31_v1 = vld [vmem:[%s755_s1 + $0x8] sm:$0xff]  ;;  %v32_v2 = vld [vmem:[%s755_s1 + $0x10] sm:$0xff]  ;;  %585 = vset.pattern.permute.xlu1 %v586_v3  ;;  %584 = vset.pattern.permute.xlu0 %v586_v3 }
   0x2   :  { %v571_v4 = vpack.c.bf16 %v31_v1, %v30_v0  ;;  %v33_v5 = vld [vmem:[%s755_s1 + $0x18] sm:$0xff]  ;;  %v14_v6 = vld [vmem:[%s756_s0] sm:$0xff]  ;;  %v230_v9 = vld [vmem:[%s757_s2 + $0x10] sm:$0xff] }
   0x3   :  { %v22_v7 = vld [vmem:[%s756_s0 + $0x40] sm:$0xff]  ;;  %v575_v8 = vpack.c.bf16 %v33_v5, %v32_v2  ;;  %547 = vmatprep.mubr.msk.f32.mxu0 %vm34_vm0, %v14_v6  ;;  %256 = vperm.xlu1 %585, %v230_v9   ;;  %v15_v11 = vld [vmem:[%s756_s0 + $0x8] sm:$0xff]  ;;  %v16_v13 = vld [vmem:[%s756_s0 + $0x10] sm:$0xff] }
   0x4   :  { %559 = vmatprep.mubr.msk.f32.mxu1 %vm34_vm0, %v22_v7  ;;  %572 = vmatprep.subr.bf16.mxu0 %v571_v4  ;;  %v228_v10 = vld [vmem:[%s757_s2] sm:$0xff]  ;;  %v23_v12 = vld [vmem:[%s756_s0 + $0x48] sm:$0xff]  ;;  %v24_v14 = vld [vmem:[%s756_s0 + $0x50] sm:$0xff] }
   0x5   :  { %579 = vmatprep.subr.bf16.mxu1 %v571_v4  ;;  %574 = vmatpush3.bf16.msra.mxu0 %v571_v4  ;;  %v231_v15 = vld [vmem:[%s757_s2 + $0x18] sm:$0xff]  ;;  %v229_v16 = vld [vmem:[%s757_s2 + $0x8] sm:$0xff]  ;;  %v18_v19 = vld [vmem:[%s756_s0 + $0x20] sm:$0xff] }
   0x6   :  { %581 = vmatpush3.bf16.msra.mxu1 %v571_v4  ;;  %576 = vmatprep.subr.bf16.mxu0 %v575_v8  ;;  %v17_v17 = vld [vmem:[%s756_s0 + $0x18] sm:$0xff]  ;;  %v26_v20 = vld [vmem:[%s756_s0 + $0x60] sm:$0xff]  ;;  %v233_v21 = vld [vmem:[%s757_s2 + $0x28] sm:$0xff] }
   0x7   :  { %580 = vmatprep.subr.bf16.mxu1 %v575_v8  ;;  %246 = vperm.xlu0 %584, %v228_v10   ;;  %v25_v18 = vld [vmem:[%s756_s0 + $0x58] sm:$0xff]  ;;  %v232_v22 = vld [vmem:[%s757_s2 + $0x20] sm:$0xff]  ;;  %v19_v23 = vld [vmem:[%s756_s0 + $0x28] sm:$0xff] }
   0x8   :  { %261 = vperm.xlu1 %585, %v231_v15   ;;  %v27_v24 = vld [vmem:[%s756_s0 + $0x68] sm:$0xff]  ;;  %v20_v25 = vld [vmem:[%s756_s0 + $0x30] sm:$0xff]  ;;  %v235_v27 = vld [vmem:[%s757_s2 + $0x38] sm:$0xff] }
   0x9   :  { %578 = vmatpush3.bf16.msra.mxu0 %v575_v8  ;;  %v28_v26 = vld [vmem:[%s756_s0 + $0x70] sm:$0xff]  ;;  %v21_v29 = vld [vmem:[%s756_s0 + $0x38] sm:$0xff]  ;;  %v237_v31 = vld [vmem:[%s757_s2 + $0x48] sm:$0xff] }
   0xa   :  { %582 = vmatpush3.bf16.msra.mxu1 %v575_v8  ;;  %v234_v28 = vld [vmem:[%s757_s2 + $0x30] sm:$0xff]  ;;  %v29_v30 = vld [vmem:[%s756_s0 + $0x78] sm:$0xff]  ;;  %v236_v32 = vld [vmem:[%s757_s2 + $0x40] sm:$0xff] }
   0xb   :  { %251 = vperm.xlu0 %584, %v229_v16   ;;  %v239_v33 = vld [vmem:[%s757_s2 + $0x58] sm:$0xff]  ;;  %v238_v34 = vld [vmem:[%s757_s2 + $0x50] sm:$0xff]  ;;  %v241_v35 = vld [vmem:[%s757_s2 + $0x68] sm:$0xff] }
   0xc   :  { %548 = vmatmul.mubr.msk.f32.vlgmr.msra.gmra.mrb[0].mxu0 %vm34_vm0, %v15_v11  ;;  %271 = vperm.xlu1 %585, %v233_v21   ;;  %v240_v36 = vld [vmem:[%s757_s2 + $0x60] sm:$0xff]  ;;  %v243_v37 = vld [vmem:[%s757_s2 + $0x78] sm:$0xff]  ;;  %v242_v38 = vld [vmem:[%s757_s2 + $0x70] sm:$0xff] }
   0xd   :  { %560 = vmatmul.mubr.msk.f32.vlgmr.msra.gmra.mrb[0].mxu1 %vm34_vm0, %v23_v12  ;;  %550 = vmatprep.mubr.msk.f32.mxu0 %vm34_vm0, %v16_v13 }
   0xe   :  { %562 = vmatprep.mubr.msk.f32.mxu1 %vm34_vm0, %v24_v14 }
   0xf   :  { %266 = vperm.xlu0 %584, %v232_v22  }
  0x10   :  { %551 = vmatmul.mubr.msk.f32.gmra.mrb[2].mxu0 %vm34_vm0, %v17_v17  ;;  %281 = vperm.xlu1 %585, %v235_v27  }
  0x11   :  { %563 = vmatmul.mubr.msk.f32.gmra.mrb[2].mxu1 %vm34_vm0, %v25_v18  ;;  %553 = vmatprep.mubr.msk.f32.mxu0 %vm34_vm0, %v18_v19 }
  0x12   :  { %565 = vmatprep.mubr.msk.f32.mxu1 %vm34_vm0, %v26_v20 }
  0x13   :  { %276 = vperm.xlu0 %584, %v234_v28  }
  0x14   :  { %554 = vmatmul.mubr.msk.f32.gmra.mrb[4].mxu0 %vm34_vm0, %v19_v23  ;;  %291 = vperm.xlu1 %585, %v237_v31  }
  0x15   :  { %566 = vmatmul.mubr.msk.f32.gmra.mrb[4].mxu1 %vm34_vm0, %v27_v24  ;;  %556 = vmatprep.mubr.msk.f32.mxu0 %vm34_vm0, %v20_v25 }
  0x16   :  { %568 = vmatprep.mubr.msk.f32.mxu1 %vm34_vm0, %v28_v26 }
  0x17   :  { %286 = vperm.xlu0 %584, %v236_v32  }
  0x18   :  { %557 = vmatmul.mubr.msk.f32.gmra.mrb[6].mxu0 %vm34_vm0, %v21_v29  ;;  %301 = vperm.xlu1 %585, %v239_v33  }
  0x19   :  { %569 = vmatmul.mubr.msk.f32.gmra.mrb[6].mxu1 %vm34_vm0, %v29_v30 }
  0x1b   :  { %296 = vperm.xlu0 %584, %v238_v34  }
  0x1c   :  { %311 = vperm.xlu1 %585, %v241_v35  }
  0x1f   :  { %306 = vperm.xlu0 %584, %v240_v36  }
  0x20   :  { %321 = vperm.xlu1 %585, %v243_v37  }
  0x23   :  { %316 = vperm.xlu0 %584, %v242_v38  }
  0x82   :  { %v257_v39 = vpop.permute.xlu1 %256 }
  0x86   :  { %v247_v40 = vpop.permute.xlu0 %246 }
  0x87   :  { %v262_v41 = vpop.permute.xlu1 %261 }
  0x8a   :  { %v252_v42 = vpop.permute.xlu0 %251 }
  0x8b   :  { %v272_v43 = vpop.permute.xlu1 %271 }
  0x8e   :  { %v267_v44 = vpop.permute.xlu0 %266 }
  0x8f   :  { %v282_v45 = vpop.permute.xlu1 %281 }
  0x92   :  { %v277_v46 = vpop.permute.xlu0 %276 }
  0x93   :  { %v292_v47 = vpop.permute.xlu1 %291 }
  0x96   :  { %v287_v48 = vpop.permute.xlu0 %286 }
  0x97   :  { %v302_v49 = vpop.permute.xlu1 %301 }
  0x9a   :  { %v297_v50 = vpop.permute.xlu0 %296 }
  0x9b   :  { %v312_v59 = vpop.permute.xlu1 %311 }
  0x9e   :  { %v307_v60 = vpop.permute.xlu0 %306 }
  0x9f   :  { %v322_v17 = vpop.permute.xlu1 %321 }
  0xa2   :  { %v317_v18 = vpop.permute.xlu0 %316 }
  0xdf   :  { %v549_v51 = vpop.f32.mrb[0].mxu0 }
  0xe0   :  { %v561_v52 = vpop.f32.mrb[0].mxu1  ;;  %v325_v53 = vmul.f32 %v549_v51, %v252_v42  ;;  %v149_v55 = vpop.f32.mrb[1].mxu0 }
  0xe1   :  { %v333_v54 = vmul.f32 %v561_v52, %v292_v47  ;;  %v189_v56 = vpop.f32.mrb[1].mxu1  ;;  %v324_v57 = vmul.f32 %v247_v40, %v149_v55 }
  0xe2   :  { %v332_v58 = vmul.f32 %v287_v48, %v189_v56 }
  0xe3   :  { %v475_v61 = vpack.c.bf16 %v325_v53, %v324_v57  ;;  %v552_v63 = vpop.f32.mrb[2].mxu0 }
  0xe4   :  { %v495_v62 = vpack.c.bf16 %v333_v54, %v332_v58  ;;  %v564_v0 = vpop.f32.mrb[2].mxu1  ;;  %v327_v1 = vmul.f32 %v552_v63, %v262_v41  ;;  %v159_v3 = vpop.f32.mrb[3].mxu0 }
  0xe5   :  { %v335_v2 = vmul.f32 %v564_v0, %v302_v49  ;;  %v199_v4 = vpop.f32.mrb[3].mxu1  ;;  %476 = vst [vmem:[%s758_s3] sm:$0xff] %v475_v61   ;;  %v326_v5 = vmul.f32 %v257_v39, %v159_v3 }
  0xe6   :  { %515 = vst [vmem:[%s758_s3 + $0x20] sm:$0xff] %v495_v62   ;;  %v334_v6 = vmul.f32 %v297_v50, %v199_v4 }
  0xe7   :  { %v480_v7 = vpack.c.bf16 %v327_v1, %v326_v5  ;;  %v555_v9 = vpop.f32.mrb[4].mxu0 }
  0xe8   :  { %v500_v8 = vpack.c.bf16 %v335_v2, %v334_v6  ;;  %v567_v10 = vpop.f32.mrb[4].mxu1  ;;  %v329_v11 = vmul.f32 %v555_v9, %v272_v43  ;;  %v169_v13 = vpop.f32.mrb[5].mxu0 }
  0xe9   :  { %v337_v12 = vmul.f32 %v567_v10, %v312_v59  ;;  %v209_v14 = vpop.f32.mrb[5].mxu1  ;;  %512 = vst [vmem:[%s758_s3 + $0x8] sm:$0xff] %v480_v7   ;;  %v328_v15 = vmul.f32 %v267_v44, %v169_v13 }
  0xea   :  { %516 = vst [vmem:[%s758_s3 + $0x28] sm:$0xff] %v500_v8   ;;  %v336_v16 = vmul.f32 %v307_v60, %v209_v14 }
  0xeb   :  { %v485_v19 = vpack.c.bf16 %v329_v11, %v328_v15  ;;  %v558_v21 = vpop.f32.mrb[6].mxu0 }
  0xec   :  { %v505_v20 = vpack.c.bf16 %v337_v12, %v336_v16  ;;  %v570_v22 = vpop.f32.mrb[6].mxu1  ;;  %v331_v23 = vmul.f32 %v558_v21, %v282_v45  ;;  %v179_v25 = vpop.f32.mrb[7].mxu0 }
  0xed   :  { %v339_v24 = vmul.f32 %v570_v22, %v322_v17  ;;  %v219_v26 = vpop.f32.mrb[7].mxu1  ;;  %513 = vst [vmem:[%s758_s3 + $0x10] sm:$0xff] %v485_v19   ;;  %v330_v27 = vmul.f32 %v277_v46, %v179_v25 }
  0xee   :  { %517 = vst [vmem:[%s758_s3 + $0x30] sm:$0xff] %v505_v20   ;;  %v338_v28 = vmul.f32 %v317_v18, %v219_v26 }
  0xef   :  { %v490_v29 = vpack.c.bf16 %v331_v23, %v330_v27 }
  0xf0   :  { %v510_v30 = vpack.c.bf16 %v339_v24, %v338_v28 }
  0xf1   :  { %514 = vst [vmem:[%s758_s3 + $0x18] sm:$0xff] %v490_v29  }
  0xf2   :  { %518 = vst [vmem:[%s758_s3 + $0x38] sm:$0xff] %v510_v30  }

</bundles_post_ra>
